<compile_context>
chip_gen: v7x
topology: tpu7x:2x2x1
jax: 0.10.0
libtpu: 0.0.40
codegen_flags: <defaults>
</compile_context>

<pallas_src>
import functools

import jax
import jax.numpy as jnp
from jax.experimental import pallas as pl
from jax.experimental.pallas import tpu as pltpu


def _ffnn_kernel(x_ref, w1_ref, b1_ref, w2_ref, o_ref):
    # x_ref:  (TM, D_in)   row tile of the flattened input
    # w1_ref: (D_in, H)    grid-invariant weight
    # b1_ref: (1, H)       grid-invariant bias
    # w2_ref: (H, D_out)   grid-invariant weight
    # o_ref:  (TM, D_out)
    h = jnp.dot(x_ref[...], w1_ref[...], preferred_element_type=jnp.float32)
    # bias add + tanh in f32 (EUP), correct/fast on v5e/v6e/v7x
    h = jnp.tanh(h + b1_ref[...].astype(jnp.float32))
    y = jnp.dot(h.astype(w2_ref.dtype), w2_ref[...],
                preferred_element_type=jnp.float32)
    o_ref[...] = y.astype(o_ref.dtype)


def _round_up(x, m):
    return ((x + m - 1) // m) * m


@functools.partial(jax.jit, static_argnames=("tm",))
def ffnn_forward(x, w1, b1, w2, *, tm=1024):
    """x: (..., input_dim). w1: (in, hid), b1: (hid,), w2: (hid, out).
    Returns (..., output_dim) in x.dtype."""
    orig_shape = x.shape
    d_in = orig_shape[-1]
    h_dim = w1.shape[1]
    d_out = w2.shape[1]

    x2d = x.reshape(-1, d_in)
    m = x2d.shape[0]

    # Large row tile, clamped to the (rounded-up) row count; multiple of 16
    # so sublane tiling is clean for f32 and bf16.  No host-side padding —
    # Pallas handles the ragged last block (rows are independent).
    tm_eff = min(int(tm), _round_up(m, 16))
    tm_eff = max(16, _round_up(tm_eff, 16))
    grid_m = pl.cdiv(m, tm_eff)

    b1_2d = b1.reshape(1, h_dim)

    def _nbytes(a):
        return a.size * a.dtype.itemsize

    cost = pl.CostEstimate(
        flops=2 * m * (d_in * h_dim + h_dim * d_out),
        transcendentals=m * h_dim,
        bytes_accessed=(_nbytes(x2d) + _nbytes(w1) + _nbytes(b1_2d)
                        + _nbytes(w2) + m * d_out * x.dtype.itemsize),
    )

    out = pl.pallas_call(
        _ffnn_kernel,
        out_shape=jax.ShapeDtypeStruct((m, d_out), x.dtype),
        grid_spec=pltpu.PrefetchScalarGridSpec(
            num_scalar_prefetch=0,
            grid=(grid_m,),
            in_specs=[
                pl.BlockSpec((tm_eff, d_in), lambda i: (i, 0)),
                pl.BlockSpec((d_in, h_dim), lambda i: (0, 0)),
                pl.BlockSpec((1, h_dim), lambda i: (0, 0)),
                pl.BlockSpec((h_dim, d_out), lambda i: (0, 0)),
            ],
            out_specs=pl.BlockSpec((tm_eff, d_out), lambda i: (i, 0)),
        ),
        compiler_params=pltpu.CompilerParams(
            dimension_semantics=("parallel",)),
        cost_estimate=cost,
    )(x2d, w1, b1_2d, w2)

    return out.reshape(*orig_shape[:-1], d_out)


if __name__ == "__main__":
    # Small shapes consistent with the module's forward: (batch, seq, input_dim)
    batch, seq = 2, 8
    input_dim, hid_units, output_dim = 16, 32, 16

    key = jax.random.PRNGKey(0)
    kx, kw1, kb1, kw2 = jax.random.split(key, 4)

    x = jax.random.normal(kx, (batch, seq, input_dim), dtype=jnp.float32)

    # Parameter shapes match nn.Linear weights, stored pre-transposed (in, out).
    w1 = jax.random.normal(kw1, (input_dim, hid_units), dtype=jnp.float32) * 0.1
    b1 = jax.random.normal(kb1, (hid_units,), dtype=jnp.float32) * 0.1
    w2 = jax.random.normal(kw2, (hid_units, output_dim), dtype=jnp.float32) * 0.1

    # f32 path — exact check against pure-JAX reference.
    y = ffnn_forward(x, w1, b1, w2)
    jax.block_until_ready(y)
    y_ref = jnp.tanh(x @ w1 + b1) @ w2
    assert y.shape == y_ref.shape
    assert jnp.allclose(y, y_ref, atol=1e-5, rtol=1e-5), "f32 mismatch vs reference"

    # bf16-traffic path (recommended on v6e/v7x): stream inputs/weights as
    # bf16; kernel keeps f32 accumulation and f32 tanh epilogue.
    xb, w1b, b1b, w2b = (a.astype(jnp.bfloat16) for a in (x, w1, b1, w2))
    yb = ffnn_forward(xb, w1b, b1b, w2b)
    jax.block_until_ready(yb)
    assert jnp.allclose(yb.astype(jnp.float32), y_ref, atol=3e-2, rtol=3e-2), \
        "bf16 mismatch vs reference"

    print("KERNEL_OK")
</pallas_src>

<mosaic_0001>
module attributes {stable_mosaic.version = 11 : i64} {
  func.func @_ffnn_kernel(%arg0: i32, %arg1: memref<16x16xf32, #tpu.memory_space<vmem>>, %arg2: memref<16x32xf32, #tpu.memory_space<vmem>>, %arg3: memref<1x32xf32, #tpu.memory_space<vmem>>, %arg4: memref<32x16xf32, #tpu.memory_space<vmem>>, %arg5: memref<16x16xf32, #tpu.memory_space<vmem>>) attributes {dimension_semantics = [#tpu.dimension_semantics<parallel>], iteration_bounds = array<i64: 1>, scalar_prefetch = 0 : i64, scratch_operands = 0 : i64, tpu.core_type = #tpu.core_type<tc>, window_params = [{transform_indices = @transform_0, window_bounds = array<i64: 16, 16>}, {pipeline_mode = #tpu.pipeline_mode<synchronous>, transform_indices = @transform_1, window_bounds = array<i64: 16, 32>}, {pipeline_mode = #tpu.pipeline_mode<synchronous>, transform_indices = @transform_2, window_bounds = array<i64: 1, 32>}, {pipeline_mode = #tpu.pipeline_mode<synchronous>, transform_indices = @transform_3, window_bounds = array<i64: 32, 16>}, {transform_indices = @transform_4, window_bounds = array<i64: 16, 16>}]} {
    %c0 = arith.constant 0 : index
    %c0_0 = arith.constant 0 : index
    %0 = vector.load %arg1[%c0, %c0_0] : memref<16x16xf32, #tpu.memory_space<vmem>>, vector<16x16xf32>
    %c0_1 = arith.constant 0 : index
    %c0_2 = arith.constant 0 : index
    %1 = vector.load %arg2[%c0_1, %c0_2] : memref<16x32xf32, #tpu.memory_space<vmem>>, vector<16x32xf32>
    %cst = arith.constant dense<0.000000e+00> : vector<16x32xf32>
    %2 = tpu.matmul %0, %1, %cst {dimension_numbers = #tpu.dot_dimension_numbers<[1], [0], [0], [1], [0, 0, 1, 1], [], []>} : vector<16x16xf32>, vector<16x32xf32>, vector<16x32xf32> -> vector<16x32xf32>
    %c0_3 = arith.constant 0 : index
    %c0_4 = arith.constant 0 : index
    %3 = vector.load %arg3[%c0_3, %c0_4] : memref<1x32xf32, #tpu.memory_space<vmem>>, vector<1x32xf32>
    %4 = vector.broadcast %3 : vector<1x32xf32> to vector<16x32xf32>
    %5 = arith.addf %2, %4 : vector<16x32xf32>
    %6 = math.tanh %5 : vector<16x32xf32>
    %c0_5 = arith.constant 0 : index
    %c0_6 = arith.constant 0 : index
    %7 = vector.load %arg4[%c0_5, %c0_6] : memref<32x16xf32, #tpu.memory_space<vmem>>, vector<32x16xf32>
    %cst_7 = arith.constant dense<0.000000e+00> : vector<16x16xf32>
    %8 = tpu.matmul %6, %7, %cst_7 {dimension_numbers = #tpu.dot_dimension_numbers<[1], [0], [0], [1], [0, 0, 1, 1], [], []>} : vector<16x32xf32>, vector<32x16xf32>, vector<16x16xf32> -> vector<16x16xf32>
    %c0_8 = arith.constant 0 : index
    %c0_9 = arith.constant 0 : index
    %9 = vector.load %arg5[%c0_8, %c0_9] : memref<16x16xf32, #tpu.memory_space<vmem>>, vector<16x16xf32>
    tpu.vector_store %arg5[%c0_8, %c0_9], %8 {strides = array<i32>} : memref<16x16xf32, #tpu.memory_space<vmem>>, vector<16x16xf32>,
    return
  }
  func.func @transform_0(%arg0: i32) -> (i32, i32) {
    %c0_i32 = arith.constant 0 : i32
    %c0_i32_0 = arith.constant 0 : i32
    return %arg0, %c0_i32 : i32, i32
  }
  func.func @transform_1(%arg0: i32) -> (i32, i32) {
    %c0_i32 = arith.constant 0 : i32
    %c0_i32_0 = arith.constant 0 : i32
    %c0_i32_1 = arith.constant 0 : i32
    return %c0_i32, %c0_i32_0 : i32, i32
  }
  func.func @transform_2(%arg0: i32) -> (i32, i32) {
    %c0_i32 = arith.constant 0 : i32
    %c0_i32_0 = arith.constant 0 : i32
    %c0_i32_1 = arith.constant 0 : i32
    return %c0_i32, %c0_i32_0 : i32, i32
  }
  func.func @transform_3(%arg0: i32) -> (i32, i32) {
    %c0_i32 = arith.constant 0 : i32
    %c0_i32_0 = arith.constant 0 : i32
    %c0_i32_1 = arith.constant 0 : i32
    return %c0_i32, %c0_i32_0 : i32, i32
  }
  func.func @transform_4(%arg0: i32) -> (i32, i32) {
    %c0_i32 = arith.constant 0 : i32
    %c0_i32_0 = arith.constant 0 : i32
    return %arg0, %c0_i32 : i32, i32
  }
}

</mosaic_0001>

<bundles_post_ra>
// kernel: ffnn_forward.1
= control target key start
LH: loop header
LB: loop body
LE: loop exit
PB: predicated region body
PF: predicated region fallthrough
CT: control target
= control target key end

     0   :  { %vm29_vm0 = vcmask 130048   ;;  %s364_s0 = inlined_call_operand.vmem [shape: f32[16,16], index: 0, kind: input, shape index: {}]   ;;  %s365_s1 = inlined_call_operand.vmem [shape: f32[16,32], index: 1, kind: input, shape index: {}]   ;;  %s366_s2 = inlined_call_operand.vmem [shape: f32[1,32], index: 2, kind: input, shape index: {}]   ;;  %s367_s3 = inlined_call_operand.vmem [shape: f32[32,16], index: 3, kind: input, shape index: {}]   ;;  %s368_s4 = inlined_call_operand.hbm [shape: f32[16,16], index: 4, kind: output, shape index: {}]  }
   0x1   :  { %v20_v0 = vld [vmem:[%s365_s1] sm:$0xff]  ;;  %v21_v1 = vld [vmem:[%s365_s1 + $0x8] sm:$0xff] }
   0x2   :  { %v18_v2 = vld [vmem:[%s364_s0] sm:$0xff]  ;;  %v250_v3 = vpack.c.bf16 %v21_v1, %v20_v0 }
   0x3   :  { %236 = vmatprep.mubr.msk.f32.mxu0 %vm29_vm0, %v18_v2 }
   0x4   :  { %9 = vsyncpa [#allocation3], 0  ;;  %251 = vmatprep.subr.bf16.mxu0 %v250_v3  ;;  %v19_v4 = vld [vmem:[%s364_s0 + $0x8] sm:$0xff]  ;;  %v113_v5 = vld [vmem:[%s367_s3] sm:$0xff]  ;;  %vm117_vm1 = vcmask 261120  }
   0x5   :  { %253 = vmatpush3.bf16.msra.mxu0 %v250_v3  ;;  %v114_v6 = vld [vmem:[%s367_s3 + $0x8] sm:$0xff]  ;;  %v115_v7 = vld [vmem:[%s367_s3 + $0x10] sm:$0xff]  ;;  %v116_v9 = vld [vmem:[%s367_s3 + $0x18] sm:$0xff]  ;;  %s293_s3 = smov [#allocation2]  }
   0x6   :  { %v254_v8 = vpack.c.bf16 %v114_v6, %v113_v5  ;;  %v258_v10 = vpack.c.bf16 %v116_v9, %v115_v7  ;;  %v217_v11 = vld [vmem:[%s366_s2] ss:$0 sm:$0xff]  ;;  %s206_s5 = sshll.u32 %s293_s3, 4  ;;  %s207_s5 = int_to_ptr.vmem [resolvable:$true] %s206_s5 }
   0x7   :  { %s269_s2 = scalar_lea.vmem %s207_s5, 256  ;;  %p274_p1 = scmp.lt.s32.totalorder %s207_s5, %s207_s5 }
   0x8   :  { %237 = vmatmul.mubr.msk.f32.vlgmr.msra.gmra.mrb[0].mxu0 %vm29_vm0, %v19_v4  ;;  %255 = vmatprep.subr.bf16.mxu1 %v254_v8  ;;  %p270_p0 = scmp.ne.s32.totalorder %s207_s5, %s269_s2  ;;  %p275_p2 = scmp.lt.s32.totalorder %s269_s2, %s269_s2 }
   0x9   :  { %257 = vmatpush3.bf16.msra.mxu1 %v254_v8 }
   0xa   :  { %259 = vmatprep.subr.bf16.mxu1 %v258_v10  ;;  %p276_p3 = por %p275_p2, %p274_p1 }
   0xc   :  { %p277_p4 = pnand %p276_p3, %p270_p0 }
   0xd   :  { %261 = vmatpush3.bf16.msra.mxu1 %v258_v10 }
  0xdb   :  { %v238_v12 = vpop.f32.mrb[0].mxu0 }
  0xdc   :  { %v108_v13 = vadd.f32 %v238_v12, %v217_v11  ;;  %v102_v14 = vpop.f32.mrb[1].mxu0 }
  0xdd   :  { %v103_v15 = vadd.f32 %v217_v11, %v102_v14 }
  0xdf   :  { %265 = vtanh.f32 %v103_v15 }
  0xe0   :  { %267 = vtanh.f32 %v108_v13 }
  0xe9   :  { %v266_v16 = vpop.eup %265 }
  0xea   :  { %v268_v17 = vpop.eup %267  ;;  %247 = vmatprep.mubr.msk.f32.mxu1 %vm117_vm1, %v266_v16 }
  0xeb   :  { %248 = vmatmul.mubr.msk.f32.vlgmr.msra.gmra.mrb[0].mxu1 %vm117_vm1, %v268_v17 }
 0x1be   :  { %v249_v18 = vpop.f32.mrb[0].mxu1 }
 0x1bf   :  { %200 = vst.msk [vmem:[#allocation2 + $0x8] sm:$0xff] %vm29_vm0, %v249_v18  ;;  %v190_v19 = vpop.f32.mrb[1].mxu1 }
 0x1c0   :  { %199 = vst.msk [vmem:[#allocation2] sm:$0xff] %vm29_vm0, %v190_v19 }
 0x1c1   :  { %280 = shalt.err (!%p277_p4)
}
 0x1c2   :  { %s281_s8 = scalar_lea.hbm %s368_s4, 256 }
 0x1c3   :  { %p282_p5 = scmp.ne.s32.totalorder %s368_s4, %s281_s8  ;;  %p285_p6 = scmp.lt.u32.totalorder %s281_s8, %s368_s4 }
 0x1c5   :  { %p287_p7 = pnand %p285_p6, %p282_p5 }
 0x1c7   :  { %290 = shalt.err (!%p287_p7)
}
 0x1c8   :  { %s294_s13 = smov 128   ;;  %s295_s14 = smov 8  }
 0x1c9   :  { %212 = dma.vmem_to_hbm [thread:$0]  %s207_s5, 256, %s368_s4, [#allocation3], %s294_s13, %s294_s13, %s295_s14  }
 0x1ca   :  { %291 = dma.done.wait [#allocation3], 256  }
 0x1cb   :  { %292 = vsyncadd [#allocation3], 4294967040 }
 0x1cc   :  { %216 = vsyncpa [#allocation3], 1 }

</bundles_post_ra>
